<compile_context>
chip_gen: v5e
topology: v5e:2x2
jax: 0.10.0
libtpu: 0.0.40
codegen_flags: <defaults>
</compile_context>

<pallas_src>
import functools

import jax
import jax.numpy as jnp
from jax.experimental import pallas as pl
from jax.experimental.pallas import tpu as pltpu

LANE = 128  # TPU lane width; also the model's hidden_dim.


def mlp_kernel(x_ref, w_ref, b_ref, o_ref, xpad_ref, *, n_states):
    """One batch tile of the fused 3-layer MLP.

    x_ref:    (TB, n_states)  f32   unpadded input tile
    w_ref:    (3, 128, 128)   bf16  packed [w1_pad, w2, w3_pad] slab (resident)
    b_ref:    (3, 128)        f32   packed [b1, b2, b3_pad] slab    (resident)
    o_ref:    (TB, 128)       f32   lane-dense output (cols >= n_actions pad)
    xpad_ref: (TB, 128)       f32   VMEM scratch used to lane-pad x to 128
    """
    # Lane-pad the input tile to a full 128-lane slab inside VMEM.  Zero the
    # scratch every step: it is cheap and keeps the kernel correct when the
    # grid axis is split across TensorCores ("parallel"), where a given core
    # may never execute program_id == 0.
    xpad_ref[...] = jnp.zeros_like(xpad_ref)
    xpad_ref[:, :n_states] = x_ref[...]
    x = xpad_ref[...].astype(jnp.bfloat16)

    b = b_ref[...]

    # fc1 + ReLU: bf16 MXU matmul, f32 accumulate, bias+ReLU on f32, downcast.
    h = jnp.dot(x, w_ref[0], preferred_element_type=jnp.float32) + b[0:1, :]
    h = jnp.maximum(h, 0.0).astype(jnp.bfloat16)

    # fc2 + ReLU
    h = jnp.dot(h, w_ref[1], preferred_element_type=jnp.float32) + b[1:2, :]
    h = jnp.maximum(h, 0.0).astype(jnp.bfloat16)

    # fc3 (no activation) -> unmasked lane-dense f32 store.
    o_ref[...] = jnp.dot(h, w_ref[2], preferred_element_type=jnp.float32) + b[2:3, :]


def pack_params(w1, b1, w2, b2, w3, b3):
    """Pack the 6 Linear params into 2 lane-dense slabs (once per weight update).

    Weights are stored (in, out), i.e. already transposed vs torch, so the kernel
    computes x @ W + b (== torch x @ weight.T + bias).  w1/w3 are zero-padded to
    (128,128) and stacked with w2 into one bf16 slab; biases are zero-padded to
    128 lanes and kept f32 so the bias add lands on the f32 MXU accumulator.
    """
    n_states, hidden = w1.shape
    n_actions = w3.shape[1]
    assert hidden == LANE, "packing assumes hidden_dim == 128"

    w1p = jnp.zeros((LANE, LANE), jnp.float32).at[:n_states, :].set(w1)
    w3p = jnp.zeros((LANE, LANE), jnp.float32).at[:, :n_actions].set(w3)
    w_slab = jnp.stack([w1p, w2, w3p]).astype(jnp.bfloat16)            # (3,128,128)

    b3p = jnp.zeros((1, LANE), jnp.float32).at[:, :n_actions].set(b3)
    b_slab = jnp.concatenate(
        [b1.reshape(1, LANE), b2.reshape(1, LANE), b3p], axis=0)       # (3,128)
    return w_slab, b_slab, n_actions


def mlp_forward(x, w_slab, b_slab, n_actions, *, block_b=None):
    """x: (B, n_states) float32. Returns (B, n_actions) float32 Q-values."""
    B, n_states = x.shape

    # One grid step for small replay batches (the whole point per the perf
    # review); tile at 512 rows only when the batch is big enough to amortize
    # per-step overhead and to profit from v7x's second TensorCore.
    if block_b is None:
        block_b = B if B <= 512 else 512

    grid_b = pl.cdiv(B, block_b)
    Bp = grid_b * block_b
    if Bp != B:  # only for large batches that don't divide the tile size
        x = jnp.concatenate(
            [x, jnp.zeros((Bp - B, n_states), x.dtype)], axis=0)

    out = pl.pallas_call(
        functools.partial(mlp_kernel, n_states=n_states),
        out_shape=jax.ShapeDtypeStruct((Bp, LANE), jnp.float32),
        grid=(grid_b,),
        in_specs=[
            # Unpadded x tile: last block dim equals full array dim -> legal.
            pl.BlockSpec((block_b, n_states), lambda i: (i, 0)),
            pl.BlockSpec((3, LANE, LANE), lambda i: (0, 0, 0)),   # weights: resident
            pl.BlockSpec((3, LANE), lambda i: (0, 0)),            # biases: resident
        ],
        out_specs=pl.BlockSpec((block_b, LANE), lambda i: (i, 0)),
        scratch_shapes=[pltpu.VMEM((block_b, LANE), jnp.float32)],
        compiler_params=pltpu.CompilerParams(
            dimension_semantics=("parallel",)),  # batch tiles shard across TCs (v7x)
    )(x, w_slab, b_slab)

    return out[:B, :n_actions]


def init_params(key, n_states, n_actions, hidden_dim=128):
    """Deterministic init mimicking nn.Linear default (uniform +-1/sqrt(fan_in))."""
    ks = jax.random.split(key, 6)

    def linear(kw, kb, fan_in, fan_out):
        bound = 1.0 / jnp.sqrt(jnp.float32(fan_in))
        w = jax.random.uniform(kw, (fan_in, fan_out), jnp.float32, -bound, bound)
        b = jax.random.uniform(kb, (1, fan_out), jnp.float32, -bound, bound)
        return w, b

    w1, b1 = linear(ks[0], ks[1], n_states, hidden_dim)
    w2, b2 = linear(ks[2], ks[3], hidden_dim, hidden_dim)
    w3, b3 = linear(ks[4], ks[5], hidden_dim, n_actions)
    return w1, b1, w2, b2, w3, b3


if __name__ == "__main__":
    n_states, n_actions, hidden_dim = 4, 2, 128
    batch = 64  # small DQN replay-style batch -> single grid step

    key = jax.random.PRNGKey(0)
    k_x, k_p = jax.random.split(key)
    x = jax.random.normal(k_x, (batch, n_states), jnp.float32)
    w1, b1, w2, b2, w3, b3 = init_params(k_p, n_states, n_actions, hidden_dim)

    w_slab, b_slab, _ = pack_params(w1, b1, w2, b2, w3, b3)
    out = mlp_forward(x, w_slab, b_slab, n_actions)
    out = jax.block_until_ready(out)
    assert out.shape == (batch, n_actions)

    # Reference 1: same bf16 weight/activation quantization as the kernel
    # (products of bf16-representable values are exact in f32, so this agrees
    # with the kernel up to f32 accumulation order).
    def bf(a):
        return a.astype(jnp.bfloat16).astype(jnp.float32)

    h1 = jnp.maximum(bf(x) @ bf(w1) + b1, 0.0)
    h2 = jnp.maximum(bf(h1) @ bf(w2) + b2, 0.0)
    ref_bf16 = bf(h2) @ bf(w3) + b3
    assert jnp.allclose(out, ref_bf16, atol=1e-3, rtol=1e-3)

    # Reference 2: pure f32 PyTorch-equivalent forward (loose check: the kernel
    # deliberately quantizes weights/activations to bf16 for the MXU).
    h1f = jnp.maximum(x @ w1 + b1, 0.0)
    h2f = jnp.maximum(h1f @ w2 + b2, 0.0)
    ref_f32 = h2f @ w3 + b3
    assert jnp.allclose(out, ref_f32, atol=5e-2, rtol=5e-2)

    print("KERNEL_OK")
</pallas_src>

<mosaic_0001>
module attributes {stable_mosaic.version = 11 : i64} {
  func.func @mlp_kernel(%arg0: i32, %arg1: memref<64x4xf32, #tpu.memory_space<vmem>>, %arg2: memref<3x128x128xbf16, #tpu.memory_space<vmem>>, %arg3: memref<3x128xf32, #tpu.memory_space<vmem>>, %arg4: memref<64x128xf32, #tpu.memory_space<vmem>>, %arg5: memref<64x128xf32, #tpu.memory_space<vmem>>) attributes {dimension_semantics = [#tpu.dimension_semantics<parallel>], iteration_bounds = array<i64: 1>, scalar_prefetch = 0 : i64, scratch_operands = 1 : i64, tpu.core_type = #tpu.core_type<tc>, window_params = [{transform_indices = @transform_0, window_bounds = array<i64: 64, 4>}, {pipeline_mode = #tpu.pipeline_mode<synchronous>, transform_indices = @transform_1, window_bounds = array<i64: 3, 128, 128>}, {pipeline_mode = #tpu.pipeline_mode<synchronous>, transform_indices = @transform_2, window_bounds = array<i64: 3, 128>}, {transform_indices = @transform_3, window_bounds = array<i64: 64, 128>}]} {
    %cst = arith.constant 0.000000e+00 : f32
    %0 = vector.broadcast %cst : f32 to vector<64x128xf32>
    %c0 = arith.constant 0 : index
    %c0_0 = arith.constant 0 : index
    %1 = vector.load %arg5[%c0, %c0_0] : memref<64x128xf32, #tpu.memory_space<vmem>>, vector<64x128xf32>
    tpu.vector_store %arg5[%c0, %c0_0], %0 {strides = array<i32>} : memref<64x128xf32, #tpu.memory_space<vmem>>, vector<64x128xf32>,
    %c0_1 = arith.constant 0 : index
    %c0_2 = arith.constant 0 : index
    %2 = vector.load %arg1[%c0_1, %c0_2] : memref<64x4xf32, #tpu.memory_space<vmem>>, vector<64x4xf32>
    %c0_3 = arith.constant 0 : index
    %c0_4 = arith.constant 0 : index
    %3 = vector.load %arg5[%c0_3, %c0_4] : memref<64x128xf32, #tpu.memory_space<vmem>>, vector<64x4xf32>
    tpu.vector_store %arg5[%c0_3, %c0_4], %2 {strides = array<i32>} : memref<64x128xf32, #tpu.memory_space<vmem>>, vector<64x4xf32>,
    %c0_5 = arith.constant 0 : index
    %c0_6 = arith.constant 0 : index
    %4 = vector.load %arg5[%c0_5, %c0_6] : memref<64x128xf32, #tpu.memory_space<vmem>>, vector<64x128xf32>
    %5 = arith.truncf %4 : vector<64x128xf32> to vector<64x128xbf16>
    %c0_7 = arith.constant 0 : index
    %c0_8 = arith.constant 0 : index
    %6 = vector.load %arg3[%c0_7, %c0_8] : memref<3x128xf32, #tpu.memory_space<vmem>>, vector<3x128xf32>
    %c0_9 = arith.constant 0 : index
    %c0_10 = arith.constant 0 : index
    %c0_11 = arith.constant 0 : index
    %7 = vector.load %arg2[%c0_9, %c0_10, %c0_11] : memref<3x128x128xbf16, #tpu.memory_space<vmem>>, vector<1x128x128xbf16>
    %8 = vector.shape_cast %7 : vector<1x128x128xbf16> to vector<128x128xbf16>
    %cst_12 = arith.constant dense<0.000000e+00> : vector<64x128xf32>
    %9 = tpu.matmul %5, %8, %cst_12 {dimension_numbers = #tpu.dot_dimension_numbers<[1], [0], [0], [1], [0, 0, 1, 1], [], []>} : vector<64x128xbf16>, vector<128x128xbf16>, vector<64x128xf32> -> vector<64x128xf32>
    %10 = vector.extract_strided_slice %6 {offsets = [0, 0], sizes = [1, 128], strides = [1, 1]} : vector<3x128xf32> to vector<1x128xf32>
    %11 = vector.broadcast %10 : vector<1x128xf32> to vector<64x128xf32>
    %12 = arith.addf %9, %11 : vector<64x128xf32>
    %cst_13 = arith.constant 0.000000e+00 : f32
    %13 = vector.broadcast %cst_13 : f32 to vector<64x128xf32>
    %14 = arith.maximumf %12, %13 : vector<64x128xf32>
    %15 = arith.truncf %14 : vector<64x128xf32> to vector<64x128xbf16>
    %c1 = arith.constant 1 : index
    %c0_14 = arith.constant 0 : index
    %c0_15 = arith.constant 0 : index
    %16 = vector.load %arg2[%c1, %c0_14, %c0_15] : memref<3x128x128xbf16, #tpu.memory_space<vmem>>, vector<1x128x128xbf16>
    %17 = vector.shape_cast %16 : vector<1x128x128xbf16> to vector<128x128xbf16>
    %cst_16 = arith.constant dense<0.000000e+00> : vector<64x128xf32>
    %18 = tpu.matmul %15, %17, %cst_16 {dimension_numbers = #tpu.dot_dimension_numbers<[1], [0], [0], [1], [0, 0, 1, 1], [], []>} : vector<64x128xbf16>, vector<128x128xbf16>, vector<64x128xf32> -> vector<64x128xf32>
    %19 = vector.extract_strided_slice %6 {offsets = [1, 0], sizes = [1, 128], strides = [1, 1]} : vector<3x128xf32> to vector<1x128xf32>
    %20 = vector.broadcast %19 : vector<1x128xf32> to vector<64x128xf32>
    %21 = arith.addf %18, %20 : vector<64x128xf32>
    %cst_17 = arith.constant 0.000000e+00 : f32
    %22 = vector.broadcast %cst_17 : f32 to vector<64x128xf32>
    %23 = arith.maximumf %21, %22 : vector<64x128xf32>
    %24 = arith.truncf %23 : vector<64x128xf32> to vector<64x128xbf16>
    %c2 = arith.constant 2 : index
    %c0_18 = arith.constant 0 : index
    %c0_19 = arith.constant 0 : index
    %25 = vector.load %arg2[%c2, %c0_18, %c0_19] : memref<3x128x128xbf16, #tpu.memory_space<vmem>>, vector<1x128x128xbf16>
    %26 = vector.shape_cast %25 : vector<1x128x128xbf16> to vector<128x128xbf16>
    %cst_20 = arith.constant dense<0.000000e+00> : vector<64x128xf32>
    %27 = tpu.matmul %24, %26, %cst_20 {dimension_numbers = #tpu.dot_dimension_numbers<[1], [0], [0], [1], [0, 0, 1, 1], [], []>} : vector<64x128xbf16>, vector<128x128xbf16>, vector<64x128xf32> -> vector<64x128xf32>
    %28 = vector.extract_strided_slice %6 {offsets = [2, 0], sizes = [1, 128], strides = [1, 1]} : vector<3x128xf32> to vector<1x128xf32>
    %29 = vector.broadcast %28 : vector<1x128xf32> to vector<64x128xf32>
    %30 = arith.addf %27, %29 : vector<64x128xf32>
    %c0_21 = arith.constant 0 : index
    %c0_22 = arith.constant 0 : index
    %31 = vector.load %arg4[%c0_21, %c0_22] : memref<64x128xf32, #tpu.memory_space<vmem>>, vector<64x128xf32>
    tpu.vector_store %arg4[%c0_21, %c0_22], %30 {strides = array<i32>} : memref<64x128xf32, #tpu.memory_space<vmem>>, vector<64x128xf32>,
    return
  }
  func.func @transform_0(%arg0: i32) -> (i32, i32) {
    %c0_i32 = arith.constant 0 : i32
    %c0_i32_0 = arith.constant 0 : i32
    return %arg0, %c0_i32 : i32, i32
  }
  func.func @transform_1(%arg0: i32) -> (i32, i32, i32) {
    %c0_i32 = arith.constant 0 : i32
    %c0_i32_0 = arith.constant 0 : i32
    %c0_i32_1 = arith.constant 0 : i32
    %c0_i32_2 = arith.constant 0 : i32
    return %c0_i32, %c0_i32_0, %c0_i32_1 : i32, i32, i32
  }
  func.func @transform_2(%arg0: i32) -> (i32, i32) {
    %c0_i32 = arith.constant 0 : i32
    %c0_i32_0 = arith.constant 0 : i32
    %c0_i32_1 = arith.constant 0 : i32
    return %c0_i32, %c0_i32_0 : i32, i32
  }
  func.func @transform_3(%arg0: i32) -> (i32, i32) {
    %c0_i32 = arith.constant 0 : i32
    %c0_i32_0 = arith.constant 0 : i32
    return %arg0, %c0_i32 : i32, i32
  }
}

</mosaic_0001>

<bundles_post_ra>
// kernel: tpu_custom_call.1
= control target key start
LH: loop header
LB: loop body
LE: loop exit
PB: predicated region body
PF: predicated region fallthrough
CT: control target
= control target key end

     0   :  { %8 = vsyncpa [#allocation4], 0  ;;  %s664_s0 = inlined_call_operand.vmem [shape: f32[64,4], index: 0, kind: input, shape index: {}]   ;;  %s665_s1 = inlined_call_operand.hbm [shape: bf16[3,128,128], index: 1, kind: input, shape index: {}]   ;;  %s666_s2 = inlined_call_operand.vmem [shape: f32[3,128], index: 2, kind: input, shape index: {}]   ;;  %s667_s3 = inlined_call_operand.hbm [shape: f32[64,128], index: 3, kind: output, shape index: {}]  }
   0x1   :  { %9 = vsyncpa [#allocation5], 0  ;;  %s16_s14 = sshll.u32 %s665_s1, 4  ;;  %s591_s15 = smov [#allocation3]   ;;  %s17_s14 = int_to_ptr.hbm [resolvable:$true] %s16_s14 }
   0x2   :  { %s18_s16 = sshll.u32 %s591_s15, 4  ;;  %s592_s17 = smov 64   ;;  %s19_s16 = int_to_ptr.vmem [resolvable:$true] %s18_s16 }
   0x3   :  { %s593_s18 = smov 4  }
   0x4   :  { %24 = dma.hbm_to_vmem [thread:$0]  %s17_s14, 3072, %s19_s16, [#allocation4], %s592_s17, %s592_s17, %s593_s18  }
   0x5   :  { %587 = dma.done.wait [#allocation4], 3072  }
   0x6   :  { %588 = vsyncadd [#allocation4], 4294964224  ;;  %v594_v0 = vmov 0.0   ;;  %v507_v1 = vld [vmem:[#allocation3 + $0x38] sm:$0xff]  ;;  %vm47_vm0 = vcmask 31744   ;;  %v506_v2 = vld [vmem:[#allocation3 + $0x30] sm:$0xff] }
   0x7   :  { %31 = vst [vmem:[#allocation2] sm:$0xff] %v594_v0  ;;  %134 = vmatpush.bf16.msra.mxu0 %v507_v1  ;;  %524 = vmatpush.bf16.msra.mxu3 %v507_v1  ;;  %v39_v3 = vld [vmem:[%s664_s0] sm:$0xff]  ;;  %v40_v4 = vld [vmem:[%s664_s0 + $0x8] sm:$0xff]  ;;  %v41_v5 = vld [vmem:[%s664_s0 + $0x10] sm:$0xff]  ;;  %s391_s11 = sshll.u32 %s667_s3, 4  ;;  %s596_s12 = smov 128   ;;  %s392_s11 = int_to_ptr.hbm [resolvable:$true] %s391_s11 }
   0x8   :  { %32 = vst [vmem:[#allocation2 + $0x8] sm:$0xff] %v594_v0  ;;  %v42_v6 = vld [vmem:[%s664_s0 + $0x18] sm:$0xff]  ;;  %v43_v7 = vld [vmem:[%s664_s0 + $0x20] sm:$0xff]  ;;  %v44_v8 = vld [vmem:[%s664_s0 + $0x28] sm:$0xff]  ;;  %s597_s13 = smov 8  }
   0x9   :  { %33 = vst [vmem:[#allocation2 + $0x10] sm:$0xff] %v594_v0  ;;  %v505_v9 = vld [vmem:[#allocation3 + $0x28] sm:$0xff]  ;;  %v504_v10 = vld [vmem:[#allocation3 + $0x20] sm:$0xff]  ;;  %v503_v11 = vld [vmem:[#allocation3 + $0x18] sm:$0xff] }
   0xa   :  { %34 = vst [vmem:[#allocation2 + $0x18] sm:$0xff] %v594_v0  ;;  %v45_v12 = vld [vmem:[%s664_s0 + $0x30] sm:$0xff]  ;;  %v46_v13 = vld [vmem:[%s664_s0 + $0x38] sm:$0xff]  ;;  %v501_v15 = vld [vmem:[#allocation3 + $0x8] sm:$0xff] }
   0xb   :  { %35 = vst [vmem:[#allocation2 + $0x20] sm:$0xff] %v594_v0  ;;  %135 = vmatpush.bf16.msra.mxu0 %v506_v2  ;;  %525 = vmatpush.bf16.msra.mxu3 %v506_v2  ;;  %v502_v14 = vld [vmem:[#allocation3 + $0x10] sm:$0xff]  ;;  %v500_v16 = vld [vmem:[#allocation3] sm:$0xff]  ;;  %v515_v23 = vld [vmem:[#allocation3 + $0x78] sm:$0xff] }
   0xc   :  { %36 = vst [vmem:[#allocation2 + $0x28] sm:$0xff] %v594_v0  ;;  %241 = vmatpush.bf16.msra.mxu1 %v515_v23  ;;  %v514_v24 = vld [vmem:[#allocation3 + $0x70] sm:$0xff]  ;;  %v513_v25 = vld [vmem:[#allocation3 + $0x68] sm:$0xff]  ;;  %v512_v28 = vld [vmem:[#allocation3 + $0x60] sm:$0xff] }
   0xd   :  { %37 = vst [vmem:[#allocation2 + $0x30] sm:$0xff] %v594_v0  ;;  %v511_v33 = vld [vmem:[#allocation3 + $0x58] sm:$0xff]  ;;  %v510_v34 = vld [vmem:[#allocation3 + $0x50] sm:$0xff]  ;;  %v509_v35 = vld [vmem:[#allocation3 + $0x48] sm:$0xff] }
   0xe   :  { %38 = vst [vmem:[#allocation2 + $0x38] sm:$0xff] %v594_v0  ;;  %v508_v36 = vld [vmem:[#allocation3 + $0x40] sm:$0xff]  ;;  %v523_v55 = vld [vmem:[#allocation3 + $0xb8] sm:$0xff]  ;;  %v522_v56 = vld [vmem:[#allocation3 + $0xb0] sm:$0xff] }
   0xf   :  { %48 = vst.msk [vmem:[#allocation2] sm:$0xff] %vm47_vm0, %v39_v3  ;;  %136 = vmatpush.bf16.msra.mxu0 %v505_v9  ;;  %526 = vmatpush.bf16.msra.mxu3 %v505_v9  ;;  %v656_v37 = vld [vmem:[%s666_s2] sm:$0x7]  ;;  %v521_v59 = vld [vmem:[#allocation3 + $0xa8] sm:$0xff]  ;;  %s595_s2 = smov [#allocation6]  }
  0x10   :  { %49 = vst.msk [vmem:[#allocation2 + $0x8] sm:$0xff] %vm47_vm0, %v40_v4  ;;  %242 = vmatpush.bf16.msra.mxu1 %v514_v24  ;;  %v85_v39 = vperm.slane %v656_v37, 0  ;;  %348 = vmatpush.bf16.msra.mxu2 %v523_v55  ;;  %v520_v63 = vld [vmem:[#allocation3 + $0xa0] sm:$0xff]  ;;  %v517_v9 = vld [vmem:[#allocation3 + $0x88] sm:$0xff]  ;;  %s389_s8 = sshll.u32 %s595_s2, 4  ;;  %s390_s8 = int_to_ptr.vmem [resolvable:$true] %s389_s8 }
  0x11   :  { %50 = vst.msk [vmem:[#allocation2 + $0x10] sm:$0xff] %vm47_vm0, %v41_v5 }
  0x12   :  { %51 = vst.msk [vmem:[#allocation2 + $0x18] sm:$0xff] %vm47_vm0, %v42_v6 }
  0x13   :  { %52 = vst.msk [vmem:[#allocation2 + $0x20] sm:$0xff] %vm47_vm0, %v43_v7  ;;  %137 = vmatpush.bf16.msra.mxu0 %v504_v10  ;;  %527 = vmatpush.bf16.msra.mxu3 %v504_v10  ;;  %v519_v7 = vld [vmem:[#allocation3 + $0x98] sm:$0xff]  ;;  %v516_v10 = vld [vmem:[#allocation3 + $0x80] sm:$0xff] }
  0x14   :  { %53 = vst.msk [vmem:[#allocation2 + $0x28] sm:$0xff] %vm47_vm0, %v44_v8  ;;  %243 = vmatpush.bf16.msra.mxu1 %v513_v25  ;;  %349 = vmatpush.bf16.msra.mxu2 %v522_v56  ;;  %v518_v8 = vld [vmem:[#allocation3 + $0x90] sm:$0xff] }
  0x15   :  { %54 = vst.msk [vmem:[#allocation2 + $0x30] sm:$0xff] %vm47_vm0, %v45_v12  ;;  %v192_v12 = vperm.slane %v656_v37, 1 }
  0x16   :  { %55 = vst.msk [vmem:[#allocation2 + $0x38] sm:$0xff] %vm47_vm0, %v46_v13  ;;  %v56_v17 = vld [vmem:[#allocation2] sm:$0xff] }
  0x17   :  { %138 = vmatpush.bf16.msra.mxu0 %v503_v11  ;;  %528 = vmatpush.bf16.msra.mxu3 %v503_v11  ;;  %v57_v18 = vld [vmem:[#allocation2 + $0x8] sm:$0xff] }
  0x18   :  { %v58_v19 = vld [vmem:[#allocation2 + $0x10] sm:$0xff]  ;;  %v64_v21 = vpack.c.bf16 %v57_v18, %v56_v17  ;;  %244 = vmatpush.bf16.msra.mxu1 %v512_v28  ;;  %350 = vmatpush.bf16.msra.mxu2 %v521_v59 }
  0x19   :  { %v59_v20 = vld [vmem:[#allocation2 + $0x18] sm:$0xff] }
  0x1a   :  { %v65_v22 = vpack.c.bf16 %v59_v20, %v58_v19  ;;  %v60_v26 = vld [vmem:[#allocation2 + $0x20] sm:$0xff] }
  0x1b   :  { %139 = vmatpush.bf16.msra.mxu0 %v502_v14  ;;  %529 = vmatpush.bf16.msra.mxu3 %v502_v14  ;;  %v61_v27 = vld [vmem:[#allocation2 + $0x28] sm:$0xff] }
  0x1c   :  { %v66_v29 = vpack.c.bf16 %v61_v27, %v60_v26  ;;  %v62_v30 = vld [vmem:[#allocation2 + $0x30] sm:$0xff]  ;;  %245 = vmatpush.bf16.msra.mxu1 %v511_v33  ;;  %351 = vmatpush.bf16.msra.mxu2 %v520_v63 }
  0x1d   :  { %v63_v31 = vld [vmem:[#allocation2 + $0x38] sm:$0xff] }
  0x1e   :  { %v67_v32 = vpack.c.bf16 %v63_v31, %v62_v30 }
  0x1f   :  { %140 = vmatpush.bf16.msra.mxu0 %v501_v15  ;;  %530 = vmatpush.bf16.msra.mxu3 %v501_v15 }
  0x20   :  { %246 = vmatpush.bf16.msra.mxu1 %v510_v34  ;;  %352 = vmatpush.bf16.msra.mxu2 %v519_v7 }
  0x23   :  { %141 = vmatpush.bf16.msra.mxu0 %v500_v16  ;;  %531 = vmatpush.bf16.msra.mxu3 %v500_v16 }
  0x24   :  { %247 = vmatpush.bf16.msra.mxu1 %v509_v35  ;;  %353 = vmatpush.bf16.msra.mxu2 %v518_v8 }
  0x26   :  { %142 = vmatmul.bf16.vlgmr.msra.gmra.mxu0 %v64_v21  ;;  %147 = vmatmul.bf16.vlgmr.msra.gmra.mxu3 %v65_v22 }
  0x28   :  { %248 = vmatpush.bf16.msra.mxu1 %v508_v36  ;;  %354 = vmatpush.bf16.msra.mxu2 %v517_v9 }
  0x2c   :  { %355 = vmatpush.bf16.msra.mxu2 %v516_v10 }
  0x36   :  { %152 = vmatmul.bf16.gmra.mxu3 %v66_v29 }
  0x46   :  { %157 = vmatmul.bf16.gmra.mxu3 %v67_v32 }
  0xa3   :  { %v143_v38 = vpop.f32.mrf.mxu0 }
  0xa4   :  { %v144_v41 = vadd.f32 %v143_v38, %v85_v39 }
  0xa6   :  { %v163_v44 = vmax.f32 %v144_v41, 0.0  ;;  %v299_v41 = vperm.slane %v656_v37, 2 }
  0xa9   :  { %v148_v40 = vpop.f32.mrf.mxu3 }
  0xaa   :  { %v149_v48 = vadd.f32 %v148_v40, %v85_v39 }
  0xab   :  { %v145_v42 = vpop.f32.mrf.mxu0 }
  0xac   :  { %v146_v43 = vadd.f32 %v145_v42, %v85_v39  ;;  %v165_v51 = vmax.f32 %v149_v48, 0.0 }
  0xae   :  { %v164_v45 = vmax.f32 %v146_v43, 0.0 }
  0xb0   :  { %v171_v46 = vpack.c.bf16 %v164_v45, %v163_v44 }
  0xb1   :  { %v150_v47 = vpop.f32.mrf.mxu3 }
  0xb2   :  { %249 = vmatmul.bf16.vlgmr.msra.gmra.mxu1 %v171_v46  ;;  %v151_v49 = vadd.f32 %v150_v47, %v85_v39 }
  0xb4   :  { %v166_v52 = vmax.f32 %v151_v49, 0.0 }
  0xb6   :  { %v172_v53 = vpack.c.bf16 %v166_v52, %v165_v51 }
  0xb9   :  { %v153_v50 = vpop.f32.mrf.mxu3 }
  0xba   :  { %v154_v57 = vadd.f32 %v153_v50, %v85_v39 }
  0xbc   :  { %v167_v61 = vmax.f32 %v154_v57, 0.0 }
  0xc1   :  { %v155_v54 = vpop.f32.mrf.mxu3 }
  0xc2   :  { %254 = vmatmul.bf16.gmra.mxu1 %v172_v53  ;;  %v156_v58 = vadd.f32 %v155_v54, %v85_v39 }
  0xc4   :  { %v168_v62 = vmax.f32 %v156_v58, 0.0 }
  0xc6   :  { %v173_v0 = vpack.c.bf16 %v168_v62, %v167_v61 }
  0xc9   :  { %v158_v60 = vpop.f32.mrf.mxu3 }
  0xca   :  { %v159_v2 = vadd.f32 %v158_v60, %v85_v39 }
  0xcc   :  { %v169_v4 = vmax.f32 %v159_v2, 0.0 }
  0xd1   :  { %v160_v1 = vpop.f32.mrf.mxu3 }
  0xd2   :  { %259 = vmatmul.bf16.gmra.mxu1 %v173_v0  ;;  %v161_v3 = vadd.f32 %v160_v1, %v85_v39 }
  0xd4   :  { %v170_v5 = vmax.f32 %v161_v3, 0.0 }
  0xd6   :  { %v174_v6 = vpack.c.bf16 %v170_v5, %v169_v4 }
  0xe2   :  { %264 = vmatmul.bf16.gmra.mxu1 %v174_v6 }
 0x12f   :  { %v250_v11 = vpop.f32.mrf.mxu1 }
 0x130   :  { %v251_v13 = vadd.f32 %v250_v11, %v192_v12 }
 0x132   :  { %v270_v16 = vmax.f32 %v251_v13, 0.0 }
 0x137   :  { %v252_v14 = vpop.f32.mrf.mxu1 }
 0x138   :  { %v253_v15 = vadd.f32 %v252_v14, %v192_v12 }
 0x13a   :  { %v271_v17 = vmax.f32 %v253_v15, 0.0 }
 0x13c   :  { %v278_v18 = vpack.c.bf16 %v271_v17, %v270_v16 }
 0x13e   :  { %356 = vmatmul.bf16.vlgmr.msra.gmra.mxu2 %v278_v18 }
 0x13f   :  { %v255_v19 = vpop.f32.mrf.mxu1 }
 0x140   :  { %v256_v20 = vadd.f32 %v255_v19, %v192_v12 }
 0x142   :  { %v272_v23 = vmax.f32 %v256_v20, 0.0 }
 0x147   :  { %v257_v21 = vpop.f32.mrf.mxu1 }
 0x148   :  { %v258_v22 = vadd.f32 %v257_v21, %v192_v12 }
 0x14a   :  { %v273_v24 = vmax.f32 %v258_v22, 0.0 }
 0x14c   :  { %v279_v25 = vpack.c.bf16 %v273_v24, %v272_v23 }
 0x14e   :  { %361 = vmatmul.bf16.gmra.mxu2 %v279_v25 }
 0x14f   :  { %v260_v26 = vpop.f32.mrf.mxu1 }
 0x150   :  { %v261_v27 = vadd.f32 %v260_v26, %v192_v12 }
 0x152   :  { %v274_v30 = vmax.f32 %v261_v27, 0.0 }
 0x157   :  { %v262_v28 = vpop.f32.mrf.mxu1 }
 0x158   :  { %v263_v29 = vadd.f32 %v262_v28, %v192_v12 }
 0x15a   :  { %v275_v31 = vmax.f32 %v263_v29, 0.0 }
 0x15c   :  { %v280_v32 = vpack.c.bf16 %v275_v31, %v274_v30 }
 0x15e   :  { %366 = vmatmul.bf16.gmra.mxu2 %v280_v32 }
 0x15f   :  { %v265_v33 = vpop.f32.mrf.mxu1 }
 0x160   :  { %v266_v34 = vadd.f32 %v265_v33, %v192_v12 }
 0x162   :  { %v276_v38 = vmax.f32 %v266_v34, 0.0 }
 0x167   :  { %v267_v35 = vpop.f32.mrf.mxu1 }
 0x168   :  { %v268_v36 = vadd.f32 %v267_v35, %v192_v12 }
 0x16a   :  { %v277_v39 = vmax.f32 %v268_v36, 0.0 }
 0x16c   :  { %v281_v40 = vpack.c.bf16 %v277_v39, %v276_v38 }
 0x16e   :  { %371 = vmatmul.bf16.gmra.mxu2 %v281_v40 }
 0x1c1   :  { %v357_v42 = vpop.f32.mrf.mxu2 }
 0x1c2   :  { %v358_v43 = vadd.f32 %v357_v42, %v299_v41 }
 0x1c4   :  { %377 = vst [vmem:[#allocation6] sm:$0xff] %v358_v43 }
 0x1c9   :  { %v359_v44 = vpop.f32.mrf.mxu2 }
 0x1ca   :  { %v360_v45 = vadd.f32 %v359_v44, %v299_v41 }
 0x1cc   :  { %378 = vst [vmem:[#allocation6 + $0x8] sm:$0xff] %v360_v45 }
 0x1d1   :  { %v362_v46 = vpop.f32.mrf.mxu2 }
 0x1d2   :  { %v363_v47 = vadd.f32 %v362_v46, %v299_v41 }
 0x1d4   :  { %379 = vst [vmem:[#allocation6 + $0x10] sm:$0xff] %v363_v47 }
 0x1d9   :  { %v364_v48 = vpop.f32.mrf.mxu2 }
 0x1da   :  { %v365_v49 = vadd.f32 %v364_v48, %v299_v41 }
 0x1dc   :  { %380 = vst [vmem:[#allocation6 + $0x18] sm:$0xff] %v365_v49 }
 0x1e1   :  { %v367_v50 = vpop.f32.mrf.mxu2 }
 0x1e2   :  { %v368_v51 = vadd.f32 %v367_v50, %v299_v41 }
 0x1e4   :  { %381 = vst [vmem:[#allocation6 + $0x20] sm:$0xff] %v368_v51 }
 0x1e9   :  { %v369_v52 = vpop.f32.mrf.mxu2 }
 0x1ea   :  { %v370_v53 = vadd.f32 %v369_v52, %v299_v41 }
 0x1ec   :  { %382 = vst [vmem:[#allocation6 + $0x28] sm:$0xff] %v370_v53 }
 0x1f1   :  { %v372_v54 = vpop.f32.mrf.mxu2 }
 0x1f2   :  { %v373_v37 = vadd.f32 %v372_v54, %v299_v41 }
 0x1f4   :  { %383 = vst [vmem:[#allocation6 + $0x30] sm:$0xff] %v373_v37 }
 0x1f9   :  { %v374_v55 = vpop.f32.mrf.mxu2 }
 0x1fa   :  { %v375_v56 = vadd.f32 %v374_v55, %v299_v41 }
 0x1fc   :  { %384 = vst [vmem:[#allocation6 + $0x38] sm:$0xff] %v375_v56 }
 0x1fd   :  { %397 = dma.vmem_to_hbm [thread:$0]  %s390_s8, 1024, %s392_s11, [#allocation5], %s596_s12, %s596_s12, %s597_s13  }
 0x1fe   :  { %589 = dma.done.wait [#allocation5], 1024  }
 0x1ff   :  { %590 = vsyncadd [#allocation5], 4294966272 }
 0x200   :  { %402 = vsyncpa [#allocation4], 1 }
 0x201   :  { %403 = vsyncpa [#allocation5], 1 }

</bundles_post_ra>
